<compile_context>
chip_gen: v5e
topology: v5e:2x2
jax: 0.10.0
libtpu: 0.0.40
codegen_flags: <defaults>
</compile_context>

<pallas_src>
import jax
import jax.numpy as jnp
from jax.experimental import pallas as pl
from jax.experimental.pallas import tpu as pltpu

NEG_SLOPE = 0.01           # nn.LeakyReLU default negative_slope
LN_EPS = 1e-5              # nn.LayerNorm default eps
SOFTPLUS_THRESHOLD = 20.0  # F.softplus default threshold (beta=1)


def _lyapunov_kernel(x_ref, w1_ref, b1_ref, w2_ref, b2_ref, w3_ref, b3_ref, out_ref):
    # x: (tb, D) -- natural batch-major layout straight from HBM (no XLA transpose).
    x = x_ref[...]
    # Hoist the tiny parameter loads once.
    w1 = w1_ref[...]; b1 = b1_ref[...]     # (H1, D),  (H1, 1)
    w2 = w2_ref[...]; b2 = b2_ref[...]     # (H2, H1), (H2, 1)
    w3 = w3_ref[...]                       # (1, H2)
    b3 = b3_ref[0]                         # scalar (SMEM)

    def leaky_relu(h):
        # max-form: drops the compare+select pair (NEG_SLOPE in (0,1) => exact).
        return jnp.maximum(h, NEG_SLOPE * h)

    def layer_norm(h):
        # Affine (g, beta) folded into the next Linear -> normalize only.
        # Single-pass variance: E[h^2] - mean^2 (one fewer full (H,tb) pass).
        mean = jnp.mean(h, axis=0, keepdims=True)
        mean_sq = jnp.mean(h * h, axis=0, keepdims=True)
        var = mean_sq - mean * mean
        return (h - mean) * jax.lax.rsqrt(var + LN_EPS)

    # Block 1: Linear -> LeakyReLU -> LayerNorm.
    # Contract over x's minor dim: (H1, D) x (tb, D) -> (H1, tb); batch lands on lanes.
    h = jax.lax.dot_general(w1, x, (((1,), (1,)), ((), ())),
                            preferred_element_type=jnp.float32) + b1
    h = layer_norm(leaky_relu(h))
    # Block 2: Linear -> LeakyReLU -> LayerNorm          (H2, tb)
    h = layer_norm(leaky_relu(
        jnp.dot(w2, h, preferred_element_type=jnp.float32) + b2))
    # Head: Linear(H2 -> 1) on the MXU -> lane-dense (1, tb)
    v = jnp.dot(w3, h, preferred_element_type=jnp.float32) + b3
    # Softplus (PyTorch semantics: identity above threshold, beta=1)
    v = jnp.where(v > SOFTPLUS_THRESHOLD, v,
                  jnp.log1p(jnp.exp(jnp.minimum(v, SOFTPLUS_THRESHOLD))))
    out_ref[...] = v.astype(out_ref.dtype)


def _round_up(x, m):
    return ((x + m - 1) // m) * m


def _fold_params(params):
    """Fold LayerNorm affine params into the following Linear and re-layout
    weights as (out, in) / biases as column vectors for the lane-major kernel."""
    (w1, b1, g1, bt1, w2, b2, g2, bt2, w3, b3) = params
    w2f = w2 * g1.T                  # (H1, H2): scale input rows of W2 by g1
    b2f = bt1 @ w2 + b2              # (1, H2)
    w3f = w3 * g2.T                  # (H2, 1)
    b3f = bt2 @ w3 + b3              # (1, 1)
    return (w1.T, b1.T, w2f.T, b2f.T, w3f.T, b3f.reshape(1))


def lyapunov_forward(state, params, *, block_b=8192):
    """state: (B, D) float32.  Returns (B, 1) float32."""
    B, D = state.shape
    w1t, b1c, w2t, b2c, w3r, b3s = _fold_params(params)
    H1 = w1t.shape[0]
    H2 = w2t.shape[0]

    # Batch tile: large (overhead-amortizing), lane-aligned, and producing >=2 grid
    # steps whenever B allows so v7x's two TensorCores both get work.
    tb_full = _round_up(B, 128)
    tb = min(block_b, tb_full)
    if tb >= tb_full and B > 128:
        tb = _round_up(pl.cdiv(B, 2), 128)
    grid = (pl.cdiv(B, tb),)

    # VMEM budget: double-buffered (D, tb) input + ~6 live (32, tb) f32 temps + output.
    est_bytes = 4 * tb * (2 * D + 6 * 32 + 2 * 8)
    vmem_limit = int(min(48 * 1024 * 1024, max(32 * 1024 * 1024, 2 * est_bytes)))

    def const_spec(shape):                 # VMEM-resident, never re-DMA'd
        return pl.BlockSpec(shape, lambda i: (0, 0))

    out_t = pl.pallas_call(
        _lyapunov_kernel,
        out_shape=jax.ShapeDtypeStruct((1, B), jnp.float32),
        grid=grid,
        in_specs=[
            pl.BlockSpec((tb, D), lambda i: (i, 0)),      # pipelined state tile (B-major)
            const_spec((H1, D)), const_spec((H1, 1)),
            const_spec((H2, H1)), const_spec((H2, 1)),
            const_spec((1, H2)),
            pl.BlockSpec(memory_space=pltpu.SMEM),        # scalar head bias
        ],
        out_specs=pl.BlockSpec((1, tb), lambda i: (0, i)),  # lane-dense output
        compiler_params=pltpu.CompilerParams(
            dimension_semantics=("parallel",),              # megacore on v7x
            vmem_limit_bytes=vmem_limit,
        ),
    )(state, w1t, b1c, w2t, b2c, w3r, b3s)
    # (1, B) -> (B, 1): identical row-major layout, pure metadata reshape.
    return out_t.reshape(B, 1)


def init_params(key, in_dim, hidden_units):
    """Deterministic synthetic parameters (Kaiming-uniform-ish, like torch Linear)."""
    params = []
    dims = [in_dim] + list(hidden_units)
    n_hidden = len(hidden_units)
    keys = jax.random.split(key, 4 * n_hidden + 1)
    ki = 0
    for d_in, d_out in zip(dims[:-1], dims[1:]):
        bound = 1.0 / jnp.sqrt(jnp.float32(d_in))
        w = jax.random.uniform(keys[ki], (d_in, d_out), jnp.float32, -bound, bound)
        b = jax.random.uniform(keys[ki + 1], (1, d_out), jnp.float32, -bound, bound)
        # Non-trivial LayerNorm affine so the wrapper-side folding is exercised.
        g = 1.0 + 0.1 * jax.random.normal(keys[ki + 2], (1, d_out), jnp.float32)
        bt = 0.1 * jax.random.normal(keys[ki + 3], (1, d_out), jnp.float32)
        ki += 4
        params += [w, b, g, bt]
    # final Linear(..., 1)
    d_in = dims[-1]
    bound = 1.0 / jnp.sqrt(jnp.float32(d_in))
    w = jax.random.uniform(keys[ki], (d_in, 1), jnp.float32, -bound, bound)
    b = jnp.zeros((1, 1), jnp.float32)
    params += [w, b]
    return tuple(params)


def lyapunov_reference(state, params):
    """Pure-JAX reference with the original (unfolded) PyTorch semantics."""
    (w1, b1, g1, bt1, w2, b2, g2, bt2, w3, b3) = params

    def block(h, w, b, g, bt):
        h = h @ w + b
        h = jnp.where(h >= 0.0, h, NEG_SLOPE * h)
        mean = jnp.mean(h, axis=-1, keepdims=True)
        var = jnp.mean((h - mean) ** 2, axis=-1, keepdims=True)
        return (h - mean) / jnp.sqrt(var + LN_EPS) * g + bt

    h = block(state, w1, b1, g1, bt1)
    h = block(h, w2, b2, g2, bt2)
    v = h @ w3 + b3
    return jnp.where(v > SOFTPLUS_THRESHOLD, v,
                     jnp.log1p(jnp.exp(jnp.minimum(v, SOFTPLUS_THRESHOLD))))


if __name__ == "__main__":
    key = jax.random.PRNGKey(0)
    k_param, k_state = jax.random.split(key)

    batch, state_dim = 256, 16       # small; batch is a multiple of the 128 lanes
    hidden_units = (32, 32)          # cfg.algo.lyapunov.hidden_units

    params = init_params(k_param, state_dim, hidden_units)
    state = jax.random.normal(k_state, (batch, state_dim), jnp.float32)

    # Default block_b=8192 -> tb is clamped to 128 here so grid=(2,): exercises the
    # batch-tiled, pipelined, multi-step path.
    out = lyapunov_forward(state, params)
    out = jax.block_until_ready(out)

    ref = lyapunov_reference(state, params)
    assert out.shape == (batch, 1)
    assert jnp.allclose(out, ref, atol=1e-4, rtol=1e-4), (out, ref)

    print("KERNEL_OK")
</pallas_src>

<mosaic_0001>
module attributes {stable_mosaic.version = 11 : i64} {
  func.func @_lyapunov_kernel(%arg0: i32, %arg1: memref<128x16xf32, #tpu.memory_space<vmem>>, %arg2: memref<32x16xf32, #tpu.memory_space<vmem>>, %arg3: memref<32x1xf32, #tpu.memory_space<vmem>>, %arg4: memref<32x32xf32, #tpu.memory_space<vmem>>, %arg5: memref<32x1xf32, #tpu.memory_space<vmem>>, %arg6: memref<1x32xf32, #tpu.memory_space<vmem>>, %arg7: memref<1xf32, #tpu.memory_space<smem>>, %arg8: memref<1x128xf32, #tpu.memory_space<vmem>>) attributes {dimension_semantics = [#tpu.dimension_semantics<parallel>], iteration_bounds = array<i64: 2>, scalar_prefetch = 0 : i64, scratch_operands = 0 : i64, tpu.core_type = #tpu.core_type<tc>, window_params = [{transform_indices = @transform_0, window_bounds = array<i64: 128, 16>}, {pipeline_mode = #tpu.pipeline_mode<synchronous>, transform_indices = @transform_1, window_bounds = array<i64: 32, 16>}, {pipeline_mode = #tpu.pipeline_mode<synchronous>, transform_indices = @transform_2, window_bounds = array<i64: 32, 1>}, {pipeline_mode = #tpu.pipeline_mode<synchronous>, transform_indices = @transform_3, window_bounds = array<i64: 32, 32>}, {pipeline_mode = #tpu.pipeline_mode<synchronous>, transform_indices = @transform_4, window_bounds = array<i64: 32, 1>}, {pipeline_mode = #tpu.pipeline_mode<synchronous>, transform_indices = @transform_5, window_bounds = array<i64: 1, 32>}, {transform_indices = @transform_6, window_bounds = array<i64: 1>}, {transform_indices = @transform_7, window_bounds = array<i64: 1, 128>}]} {
    %c0 = arith.constant 0 : index
    %c0_0 = arith.constant 0 : index
    %0 = vector.load %arg1[%c0, %c0_0] : memref<128x16xf32, #tpu.memory_space<vmem>>, vector<128x16xf32>
    %c0_1 = arith.constant 0 : index
    %c0_2 = arith.constant 0 : index
    %1 = vector.load %arg2[%c0_1, %c0_2] : memref<32x16xf32, #tpu.memory_space<vmem>>, vector<32x16xf32>
    %c0_3 = arith.constant 0 : index
    %c0_4 = arith.constant 0 : index
    %2 = vector.load %arg3[%c0_3, %c0_4] : memref<32x1xf32, #tpu.memory_space<vmem>>, vector<32x1xf32>
    %c0_5 = arith.constant 0 : index
    %c0_6 = arith.constant 0 : index
    %3 = vector.load %arg4[%c0_5, %c0_6] : memref<32x32xf32, #tpu.memory_space<vmem>>, vector<32x32xf32>
    %c0_7 = arith.constant 0 : index
    %c0_8 = arith.constant 0 : index
    %4 = vector.load %arg5[%c0_7, %c0_8] : memref<32x1xf32, #tpu.memory_space<vmem>>, vector<32x1xf32>
    %c0_9 = arith.constant 0 : index
    %c0_10 = arith.constant 0 : index
    %5 = vector.load %arg6[%c0_9, %c0_10] : memref<1x32xf32, #tpu.memory_space<vmem>>, vector<1x32xf32>
    %c0_11 = arith.constant 0 : index
    %6 = memref.load %arg7[%c0_11] : memref<1xf32, #tpu.memory_space<smem>>
    %cst = arith.constant dense<0.000000e+00> : vector<32x128xf32>
    %7 = tpu.matmul %1, %0, %cst {dimension_numbers = #tpu.dot_dimension_numbers<[1], [1], [0], [0], [0, 0, 1, 0], [], []>} : vector<32x16xf32>, vector<128x16xf32>, vector<32x128xf32> -> vector<32x128xf32>
    %8 = vector.broadcast %2 : vector<32x1xf32> to vector<32x128xf32>
    %9 = arith.addf %7, %8 : vector<32x128xf32>
    %cst_12 = arith.constant 0.00999999977 : f32
    %10 = vector.broadcast %cst_12 : f32 to vector<32x128xf32>
    %11 = arith.mulf %10, %9 : vector<32x128xf32>
    %12 = arith.maximumf %9, %11 : vector<32x128xf32>
    %cst_13 = arith.constant dense<0.000000e+00> : vector<128xf32>
    %13 = vector.multi_reduction <add>, %12, %cst_13 [0] : vector<32x128xf32> to vector<128xf32>
    %14 = vector.shape_cast %13 : vector<128xf32> to vector<1x128xf32>
    %cst_14 = arith.constant 3.200000e+01 : f32
    %15 = vector.broadcast %cst_14 : f32 to vector<1x128xf32>
    %16 = arith.divf %14, %15 : vector<1x128xf32>
    %17 = arith.mulf %12, %12 : vector<32x128xf32>
    %cst_15 = arith.constant dense<0.000000e+00> : vector<128xf32>
    %18 = vector.multi_reduction <add>, %17, %cst_15 [0] : vector<32x128xf32> to vector<128xf32>
    %19 = vector.shape_cast %18 : vector<128xf32> to vector<1x128xf32>
    %cst_16 = arith.constant 3.200000e+01 : f32
    %20 = vector.broadcast %cst_16 : f32 to vector<1x128xf32>
    %21 = arith.divf %19, %20 : vector<1x128xf32>
    %22 = arith.mulf %16, %16 : vector<1x128xf32>
    %23 = arith.subf %21, %22 : vector<1x128xf32>
    %24 = vector.broadcast %16 : vector<1x128xf32> to vector<32x128xf32>
    %25 = arith.subf %12, %24 : vector<32x128xf32>
    %cst_17 = arith.constant 9.99999974E-6 : f32
    %26 = vector.broadcast %cst_17 : f32 to vector<1x128xf32>
    %27 = arith.addf %23, %26 : vector<1x128xf32>
    %28 = math.rsqrt %27 : vector<1x128xf32>
    %29 = vector.broadcast %28 : vector<1x128xf32> to vector<32x128xf32>
    %30 = arith.mulf %25, %29 : vector<32x128xf32>
    %cst_18 = arith.constant dense<0.000000e+00> : vector<32x128xf32>
    %31 = tpu.matmul %3, %30, %cst_18 {dimension_numbers = #tpu.dot_dimension_numbers<[1], [0], [0], [1], [0, 0, 1, 1], [], []>} : vector<32x32xf32>, vector<32x128xf32>, vector<32x128xf32> -> vector<32x128xf32>
    %32 = vector.broadcast %4 : vector<32x1xf32> to vector<32x128xf32>
    %33 = arith.addf %31, %32 : vector<32x128xf32>
    %cst_19 = arith.constant 0.00999999977 : f32
    %34 = vector.broadcast %cst_19 : f32 to vector<32x128xf32>
    %35 = arith.mulf %34, %33 : vector<32x128xf32>
    %36 = arith.maximumf %33, %35 : vector<32x128xf32>
    %cst_20 = arith.constant dense<0.000000e+00> : vector<128xf32>
    %37 = vector.multi_reduction <add>, %36, %cst_20 [0] : vector<32x128xf32> to vector<128xf32>
    %38 = vector.shape_cast %37 : vector<128xf32> to vector<1x128xf32>
    %cst_21 = arith.constant 3.200000e+01 : f32
    %39 = vector.broadcast %cst_21 : f32 to vector<1x128xf32>
    %40 = arith.divf %38, %39 : vector<1x128xf32>
    %41 = arith.mulf %36, %36 : vector<32x128xf32>
    %cst_22 = arith.constant dense<0.000000e+00> : vector<128xf32>
    %42 = vector.multi_reduction <add>, %41, %cst_22 [0] : vector<32x128xf32> to vector<128xf32>
    %43 = vector.shape_cast %42 : vector<128xf32> to vector<1x128xf32>
    %cst_23 = arith.constant 3.200000e+01 : f32
    %44 = vector.broadcast %cst_23 : f32 to vector<1x128xf32>
    %45 = arith.divf %43, %44 : vector<1x128xf32>
    %46 = arith.mulf %40, %40 : vector<1x128xf32>
    %47 = arith.subf %45, %46 : vector<1x128xf32>
    %48 = vector.broadcast %40 : vector<1x128xf32> to vector<32x128xf32>
    %49 = arith.subf %36, %48 : vector<32x128xf32>
    %cst_24 = arith.constant 9.99999974E-6 : f32
    %50 = vector.broadcast %cst_24 : f32 to vector<1x128xf32>
    %51 = arith.addf %47, %50 : vector<1x128xf32>
    %52 = math.rsqrt %51 : vector<1x128xf32>
    %53 = vector.broadcast %52 : vector<1x128xf32> to vector<32x128xf32>
    %54 = arith.mulf %49, %53 : vector<32x128xf32>
    %cst_25 = arith.constant dense<0.000000e+00> : vector<1x128xf32>
    %55 = tpu.matmul %5, %54, %cst_25 {dimension_numbers = #tpu.dot_dimension_numbers<[1], [0], [0], [1], [0, 0, 1, 1], [], []>} : vector<1x32xf32>, vector<32x128xf32>, vector<1x128xf32> -> vector<1x128xf32>
    %56 = vector.broadcast %6 : f32 to vector<1x128xf32>
    %57 = arith.addf %55, %56 : vector<1x128xf32>
    %cst_26 = arith.constant 2.000000e+01 : f32
    %58 = vector.broadcast %cst_26 : f32 to vector<1x128xf32>
    %59 = arith.cmpf ogt, %57, %58 : vector<1x128xf32>
    %cst_27 = arith.constant 2.000000e+01 : f32
    %60 = vector.broadcast %cst_27 : f32 to vector<1x128xf32>
    %61 = arith.minimumf %57, %60 : vector<1x128xf32>
    %62 = math.exp %61 : vector<1x128xf32>
    %63 = math.log1p %62 : vector<1x128xf32>
    %64 = arith.select %59, %57, %63 : vector<1x128xi1>, vector<1x128xf32>
    %c0_28 = arith.constant 0 : index
    %c0_29 = arith.constant 0 : index
    %65 = vector.load %arg8[%c0_28, %c0_29] : memref<1x128xf32, #tpu.memory_space<vmem>>, vector<1x128xf32>
    tpu.vector_store %arg8[%c0_28, %c0_29], %64 {strides = array<i32>} : memref<1x128xf32, #tpu.memory_space<vmem>>, vector<1x128xf32>,
    return
  }
  func.func @transform_0(%arg0: i32) -> (i32, i32) {
    %c0_i32 = arith.constant 0 : i32
    %c0_i32_0 = arith.constant 0 : i32
    return %arg0, %c0_i32 : i32, i32
  }
  func.func @transform_1(%arg0: i32) -> (i32, i32) {
    %c0_i32 = arith.constant 0 : i32
    %c0_i32_0 = arith.constant 0 : i32
    %c0_i32_1 = arith.constant 0 : i32
    return %c0_i32, %c0_i32_0 : i32, i32
  }
  func.func @transform_2(%arg0: i32) -> (i32, i32) {
    %c0_i32 = arith.constant 0 : i32
    %c0_i32_0 = arith.constant 0 : i32
    %c0_i32_1 = arith.constant 0 : i32
    return %c0_i32, %c0_i32_0 : i32, i32
  }
  func.func @transform_3(%arg0: i32) -> (i32, i32) {
    %c0_i32 = arith.constant 0 : i32
    %c0_i32_0 = arith.constant 0 : i32
    %c0_i32_1 = arith.constant 0 : i32
    return %c0_i32, %c0_i32_0 : i32, i32
  }
  func.func @transform_4(%arg0: i32) -> (i32, i32) {
    %c0_i32 = arith.constant 0 : i32
    %c0_i32_0 = arith.constant 0 : i32
    %c0_i32_1 = arith.constant 0 : i32
    return %c0_i32, %c0_i32_0 : i32, i32
  }
  func.func @transform_5(%arg0: i32) -> (i32, i32) {
    %c0_i32 = arith.constant 0 : i32
    %c0_i32_0 = arith.constant 0 : i32
    %c0_i32_1 = arith.constant 0 : i32
    return %c0_i32, %c0_i32_0 : i32, i32
  }
  func.func @transform_6(%arg0: i32) -> i32 {
    %c0_i32 = arith.constant 0 : i32
    %c0_i32_0 = arith.constant 0 : i32
    return %c0_i32 : i32
  }
  func.func @transform_7(%arg0: i32) -> (i32, i32) {
    %c0_i32 = arith.constant 0 : i32
    %c0_i32_0 = arith.constant 0 : i32
    return %c0_i32, %arg0 : i32, i32
  }
}

</mosaic_0001>

<bundles_post_ra>
// kernel: tpu_custom_call.1
= control target key start
LH: loop header
LB: loop body
LE: loop exit
PB: predicated region body
PF: predicated region fallthrough
CT: control target
= control target key end

     0   :  { %s1123_s0 = inlined_call_operand.vmem [shape: f32[256,16], index: 0, kind: input, shape index: {}]   ;;  %s1124_s1 = inlined_call_operand.vmem [shape: f32[32,16], index: 1, kind: input, shape index: {}]   ;;  %s1125_s2 = inlined_call_operand.vmem [shape: f32[32,1], index: 2, kind: input, shape index: {}]   ;;  %s1126_s3 = inlined_call_operand.vmem [shape: f32[32,32], index: 3, kind: input, shape index: {}]   ;;  %s1127_s4 = inlined_call_operand.vmem [shape: f32[32,1], index: 4, kind: input, shape index: {}]   ;;  %s1128_s5 = inlined_call_operand.vmem [shape: f32[1,32], index: 5, kind: input, shape index: {}]   ;;  %s1129_s6 = inlined_call_operand.<no memory space> [shape: f32[1], index: 6, kind: input, shape index: {}]   ;;  %s1130_s7 = inlined_call_operand.hbm [shape: f32[1,256], index: 7, kind: output, shape index: {}]  }
   0x1   :  { %12 = sst [smem:[#allocation2]] %s1129_s6 }
   0x2   :  { %13 = vsyncpa [#allocation4], 0 }
   0x3   :  { %15 = vsyncpa [#allocation4 + $0x1], 0  ;;  %s917_s26 = smov 0   ;;  %s919_s27 = smov 0  }
   0x4   :  { %s921_s28 = smov 0   ;;  %s923_s29 = smov 0  }
   0x5 LB: > { %s938_s6 = sadd.s32 4294967295, %s870_s29   ;;  %s705_s30 = sadd.s32 4294967294, %s870_s29   ;;  %s870_s29 = sphi %s923_s29, %s1136_s29   ;;  %s866_s28 = sphi %s921_s28, %s1135_s28   ;;  %s862_s27 = sphi %s919_s27, %s1134_s27   ;;  %s858_s26 = sphi %s917_s26, %s1133_s26  }
   0x6   : > { %s942_s8 = sadd.s32 1, %s870_s29   ;;  %s180_s9 = sadd.s32 1, %s866_s28 }
   0x7   : > { %s177_s10 = ssub.s32 %s870_s29, %s942_s8  ;;  %p190_p0 = scmp.ne.s32.totalorder %s866_s28, %s862_s27 }
   0x8   : > { %p178_p1 = scmp.eq.s32.totalorder %s177_s10, 0  ;;  %p191_p2 = scmp.eq.s32.totalorder %s938_s6, 1 }
   0x9   : > { %p196_p3 = scmp.ne.s32.totalorder %s862_s27, %s858_s26  ;;  %p197_p4 = scmp.eq.s32.totalorder %s705_s30, 1 }
   0xa   : > { %s953_s11 = scalar_select %p178_p1, %s866_s28, %s180_s9  }
   0xb   : > { %p955_p5 = por %p191_p2, %p190_p0  ;;  %p959_p6 = por %p197_p4, %p196_p3 }
   0xc   : > { %p708_p7 = scmp.ge.s32.totalorder %s870_s29, 1  ;;  %p242_p8 = scmp.lt.s32.totalorder %s870_s29, 3 }
   0xe   : > { %p243_p9 = pnand %p708_p7, %p242_p8 }
   0xf   : > { %s709_s14 = sshll.u32 (!%p243_p9), %s938_s6, 4  ;;  %s312_s23 = sld [smem:[#allocation2]] (!%p243_p9) }
  0x10   : > { %246 = sbr.rel (%p243_p9) target bundleno = 657 (0x291), region = 48  ;;  %p274_p10 = scmp.lt.s32.totalorder (!%p243_p9), %s709_s14, 31 }
  0x11   : > { %s271_s24 = sand.u32 (!%p243_p9), 1, %s862_s27   ;;  %s646_s9 = scalar_lea.hbm (!%p243_p9), %s1130_s7, %s938_s6 }
  0x12   : > { %s272_s10 = scalar_lea.vmem (!%p243_p9), [#allocation3], %s271_s24  ;;  %s638_s16 = scalar_lea.sflag (!%p243_p9), [#allocation4], %s271_s24 }
  0x13   : > { %s828_s21 = scalar_lea.hbm (!%p243_p9), %s1130_s7, 2 }
  0x15   : > { %s1138_s14 = smov (!%p274_p10, %s709_s14), 31  ;;  %vm333_vm0 = vcmask 130048   ;;  %v299_v9 = vld [vmem:[%s1125_s2] sm:$0xff]  ;;  %v872_v11 = vmov 0   ;;  %v301_v13 = vld [vmem:[%s1125_s2 + $0x10] sm:$0xff]  ;;  %v300_v14 = vld [vmem:[%s1125_s2 + $0x8] sm:$0xff] }
  0x16   : > { %s710_s15 = sshll.u32 %s1138_s14, 3  ;;  %795 = vset.pattern.permute.xlu0 %v872_v11  ;;  %796 = vset.pattern.permute.xlu1 %v872_v11  ;;  %v302_v17 = vld [vmem:[%s1125_s2 + $0x18] sm:$0xff]  ;;  %v309_v18 = vld [vmem:[%s1127_s4 + $0x10] sm:$0xff]  ;;  %v296_v23 = vld [vmem:[%s1124_s1 + $0x8] sm:$0xff]  ;;  %v873_v38 = vmov 32.0   ;;  %vm503_vm5 = vcmask 261120  }
  0x17   : > { %s969_s18 = scalar_lea.vmem %s1123_s0, %s710_s15  ;;  %315 = vperm.xlu0 %795, %v299_v9   ;;  %797 = vset.pattern.permute.xlu2 %v872_v11  ;;  %v310_v21 = vld [vmem:[%s1127_s4 + $0x18] sm:$0xff]  ;;  %v295_v24 = vld [vmem:[%s1124_s1] sm:$0xff]  ;;  %v297_v25 = vld [vmem:[%s1124_s1 + $0x10] sm:$0xff]  ;;  %798 = vrcp.f32 %v873_v38  ;;  %s648_s14 = sshll.u32 %s272_s10, 4  ;;  %s649_s14 = int_to_ptr.vmem [resolvable:$true] %s648_s14 }
  0x18   : > { %v294_v0 = vld [vmem:[%s969_s18 + $0x78] sm:$0xff]  ;;  %v293_v1 = vld [vmem:[%s969_s18 + $0x70] sm:$0xff]  ;;  %v292_v2 = vld [vmem:[%s969_s18 + $0x68] sm:$0xff]  ;;  %325 = vperm.xlu1 %796, %v301_v13   ;;  %s650_s15 = sshll.u32 %s646_s9, 4  ;;  %s651_s15 = int_to_ptr.hbm [resolvable:$true] %s650_s15 }
  0x19   : > { %738 = vmatpush.xpose.msk.msra.mxu3 %vm333_vm0, %v294_v0  ;;  %711 = vmatpush.xpose.msk.msra.mxu0 %vm333_vm0, %v294_v0  ;;  %v291_v3 = vld [vmem:[%s969_s18 + $0x60] sm:$0xff]  ;;  %v290_v4 = vld [vmem:[%s969_s18 + $0x58] sm:$0xff]  ;;  %v289_v5 = vld [vmem:[%s969_s18 + $0x50] sm:$0xff]  ;;  %s822_s17 = sshra.s32 %s651_s15, 4  ;;  %s823_s17 = int_to_ptr.hbm [resolvable:$true] %s822_s17 }
  0x1a   : > { %v288_v6 = vld [vmem:[%s969_s18 + $0x48] sm:$0xff]  ;;  %v287_v7 = vld [vmem:[%s969_s18 + $0x40] sm:$0xff]  ;;  %v286_v8 = vld [vmem:[%s969_s18 + $0x38] sm:$0xff]  ;;  %s824_s19 = scalar_lea.hbm %s823_s17, 1  ;;  %p829_p0 = scmp.lt.s32.totalorder %s823_s17, %s1130_s7 }
  0x1b   : > { %v285_v10 = vld [vmem:[%s969_s18 + $0x30] sm:$0xff]  ;;  %v284_v12 = vld [vmem:[%s969_s18 + $0x28] sm:$0xff]  ;;  %v283_v15 = vld [vmem:[%s969_s18 + $0x20] sm:$0xff]  ;;  %p825_p11 = scmp.ne.s32.totalorder %s823_s17, %s824_s19  ;;  %p830_p1 = scmp.lt.s32.totalorder %s828_s21, %s824_s19 }
  0x1c   : > { %v282_v16 = vld [vmem:[%s969_s18 + $0x18] sm:$0xff]  ;;  %v281_v19 = vld [vmem:[%s969_s18 + $0x10] sm:$0xff]  ;;  %v280_v20 = vld [vmem:[%s969_s18 + $0x8] sm:$0xff] }
  0x1d   : > { %739 = vmatpush.xpose.msk.msra.mxu3 %vm333_vm0, %v293_v1  ;;  %712 = vmatpush.xpose.msk.msra.mxu0 %vm333_vm0, %v293_v1  ;;  %v279_v22 = vld [vmem:[%s969_s18] sm:$0xff]  ;;  %v298_v26 = vld [vmem:[%s1124_s1 + $0x18] sm:$0xff]  ;;  %v799_v42 = vpop.eup %798  ;;  %p826_p12 = pnand %p825_p11, %p955_p5  ;;  %p831_p2 = por %p830_p1, %p829_p0 }
  0x1e   : > { %v441_v49 = vmul.f32 32.0, %v799_v42  ;;  %vm445_vm1 = vweird.f32 %v799_v42 }
  0x1f   : > { %320 = vperm.xlu0 %795, %v300_v14   ;;  %p827_p13 = pneg %p826_p12 }
  0x20   : > { %330 = vperm.xlu1 %796, %v302_v17   ;;  %v442_v56 = vsub.f32 1.0, %v441_v49 }
  0x21   : > { %740 = vmatpush.xpose.msk.msra.mxu3 %vm333_vm0, %v292_v2  ;;  %713 = vmatpush.xpose.msk.msra.mxu0 %vm333_vm0, %v292_v2  ;;  %p832_p3 = pnand %p831_p2, %p827_p13 }
  0x22   : > { %v443_v62 = vmul.f32 %v799_v42, %v442_v56 }
  0x25   : > { %741 = vmatpush.xpose.msk.msra.mxu3 %vm333_vm0, %v291_v3  ;;  %714 = vmatpush.xpose.msk.msra.mxu0 %vm333_vm0, %v291_v3  ;;  %v444_v3 = vadd.f32 %v799_v42, %v443_v62 }
  0x27   : > { %495 = vperm.xlu0 %795, %v309_v18  }
  0x28   : > { %500 = vperm.xlu1 %796, %v310_v21  }
  0x29   : > { %742 = vmatpush.xpose.msk.msra.mxu3 %vm333_vm0, %v290_v4  ;;  %715 = vmatpush.xpose.msk.msra.mxu0 %vm333_vm0, %v290_v4 }
  0x2d   : > { %743 = vmatpush.xpose.msk.msra.mxu3 %vm333_vm0, %v289_v5  ;;  %716 = vmatpush.xpose.msk.msra.mxu0 %vm333_vm0, %v289_v5 }
  0x31   : > { %744 = vmatpush.xpose.msk.msra.mxu3 %vm333_vm0, %v288_v6  ;;  %717 = vmatpush.xpose.msk.msra.mxu0 %vm333_vm0, %v288_v6 }
  0x35   : > { %745 = vmatpush.xpose.msk.msra.mxu3 %vm333_vm0, %v287_v7  ;;  %718 = vmatpush.xpose.msk.msra.mxu0 %vm333_vm0, %v287_v7 }
  0x39   : > { %746 = vmatpush.xpose.msk.msra.mxu3 %vm333_vm0, %v286_v8  ;;  %719 = vmatpush.xpose.msk.msra.mxu0 %vm333_vm0, %v286_v8  ;;  %v1058_v8 = vsel %vm445_vm1, %v799_v42, %v444_v3 }
  0x3d   : > { %747 = vmatpush.xpose.msk.msra.mxu3 %vm333_vm0, %v285_v10  ;;  %720 = vmatpush.xpose.msk.msra.mxu0 %vm333_vm0, %v285_v10 }
  0x41   : > { %748 = vmatpush.xpose.msk.msra.mxu3 %vm333_vm0, %v284_v12  ;;  %721 = vmatpush.xpose.msk.msra.mxu0 %vm333_vm0, %v284_v12 }
  0x45   : > { %749 = vmatpush.xpose.msk.msra.mxu3 %vm333_vm0, %v283_v15  ;;  %722 = vmatpush.xpose.msk.msra.mxu0 %vm333_vm0, %v283_v15 }
  0x49   : > { %750 = vmatpush.xpose.msk.msra.mxu3 %vm333_vm0, %v282_v16  ;;  %723 = vmatpush.xpose.msk.msra.mxu0 %vm333_vm0, %v282_v16 }
  0x4d   : > { %751 = vmatpush.xpose.msk.msra.mxu3 %vm333_vm0, %v281_v19  ;;  %724 = vmatpush.xpose.msk.msra.mxu0 %vm333_vm0, %v281_v19 }
  0x51   : > { %752 = vmatpush.xpose.msk.msra.mxu3 %vm333_vm0, %v280_v20  ;;  %725 = vmatpush.xpose.msk.msra.mxu0 %vm333_vm0, %v280_v20 }
  0x55   : > { %753 = vmatpush.xpose.msk.msra.mxu3 %vm333_vm0, %v279_v22  ;;  %726 = vmatpush.xpose.msk.msra.mxu0 %vm333_vm0, %v279_v22 }
  0x58   : > { %728 = vmatmul.msk.f32.vlgmr.msra.gmra.mxu3 %vm333_vm0, %v296_v23  ;;  %727 = vmatmul.msk.f32.vlgmr.msra.gmra.mxu0 %vm333_vm0, %v295_v24 }
  0x60   : > { %729 = vmatmul.msk.f32.gmra.mxu3 %vm333_vm0, %v297_v25 }
  0x68   : > { %730 = vmatmul.msk.f32.gmra.mxu3 %vm333_vm0, %v298_v26 }
  0x89   : > { %v316_v27 = vpop.permute.xlu0 %315 }
  0x8a   : > { %v326_v33 = vpop.permute.xlu1 %325 }
  0x91   : > { %v321_v30 = vpop.permute.xlu0 %320 }
  0x92   : > { %v331_v44 = vpop.permute.xlu1 %330 }
  0xd5   : > { %v411_v29 = vpop.f32.mrf.mxu0 }
  0xd6   : > { %v412_v31 = vadd.f32 %v411_v29, %v316_v27  ;;  %v307_v27 = vld [vmem:[%s1127_s4] sm:$0xff] }
  0xd7   : > { %485 = vperm.xlu2 %797, %v307_v27  }
  0xd8   : > { %v423_v35 = vmul.f32 0.01, %v412_v31 }
  0xda   : > { %v1053_v40 = vmax.f32 %v412_v31, %v423_v35  ;;  %v304_v35 = vld [vmem:[%s1126_s3 + $0x8] sm:$0xff] }
  0xdb   : > { %v414_v28 = vpop.f32.mrf.mxu3 }
  0xdc   : > { %v415_v32 = vadd.f32 %v414_v28, %v321_v30  ;;  %v448_v46 = vmul.f32 %v1053_v40, %v1053_v40 }
  0xde   : > { %v424_v36 = vmul.f32 0.01, %v415_v32 }
  0xe0   : > { %v428_v41 = vmax.f32 %v415_v32, %v424_v36  ;;  %v305_v36 = vld [vmem:[%s1126_s3 + $0x10] sm:$0xff] }
  0xe2   : > { %v449_v47 = vmul.f32 %v428_v41, %v428_v41  ;;  %v431_v50 = vadd.f32 %v428_v41, %v1053_v40 }
  0xe3   : > { %v417_v34 = vpop.f32.mrf.mxu3 }
  0xe4   : > { %v418_v37 = vadd.f32 %v417_v34, %v326_v33  ;;  %v452_v53 = vadd.f32 %v449_v47, %v448_v46  ;;  %v303_v33 = vld [vmem:[%s1126_s3] sm:$0xff]  ;;  %v308_v34 = vld [vmem:[%s1127_s4 + $0x8] sm:$0xff] }
  0xe5   : > { %490 = vperm.xlu2 %797, %v308_v34  }
  0xe6   : > { %v425_v39 = vmul.f32 0.01, %v418_v37 }
  0xe8   : > { %v429_v43 = vmax.f32 %v418_v37, %v425_v39  ;;  %v306_v37 = vld [vmem:[%s1126_s3 + $0x18] sm:$0xff] }
  0xea   : > { %v450_v51 = vmul.f32 %v429_v43, %v429_v43  ;;  %v432_v54 = vadd.f32 %v431_v50, %v429_v43 }
  0xeb   : > { %v420_v45 = vpop.f32.mrf.mxu3 }
  0xec   : > { %v421_v48 = vadd.f32 %v420_v45, %v331_v44  ;;  %v453_v57 = vadd.f32 %v452_v53, %v450_v51  ;;  %v496_v44 = vpop.permute.xlu0 %495  ;;  %v501_v53 = vpop.permute.xlu1 %500 }
  0xee   : > { %v426_v52 = vmul.f32 0.01, %v421_v48 }
  0xf0   : > { %v430_v55 = vmax.f32 %v421_v48, %v426_v52 }
  0xf2   : > { %v433_v58 = vadd.f32 %v432_v54, %v430_v55  ;;  %v451_v59 = vmul.f32 %v430_v55, %v430_v55 }
  0xf4   : > { %v434_v60 = vrot.slane %v433_v58, 4  ;;  %v454_v61 = vadd.f32 %v453_v57, %v451_v59 }
  0xf6   : > { %v435_v63 = vadd.f32 %v434_v60, %v433_v58  ;;  %v455_v0 = vrot.slane %v454_v61, 4 }
  0xf8   : > { %v436_v1 = vrot.slane %v435_v63, 2  ;;  %v456_v2 = vadd.f32 %v455_v0, %v454_v61 }
  0xfa   : > { %v437_v4 = vadd.f32 %v436_v1, %v435_v63  ;;  %v457_v5 = vrot.slane %v456_v2, 2 }
  0xfc   : > { %v438_v6 = vrot.slane %v437_v4, 1  ;;  %v458_v7 = vadd.f32 %v457_v5, %v456_v2 }
  0xfe   : > { %v439_v9 = vadd.f32 %v438_v6, %v437_v4  ;;  %v459_v10 = vrot.slane %v458_v7, 1 }
 0x100   : > { %v460_v11 = vadd.f32 %v459_v10, %v458_v7  ;;  %v447_v12 = vmul.f32 %v1058_v8, %v439_v9 }
 0x102   : > { %v461_v13 = vmul.f32 %v460_v11, %v1058_v8  ;;  %v462_v14 = vmul.f32 %v447_v12, %v447_v12  ;;  %v467_v23 = vsub.f32 %v430_v55, %v447_v12  ;;  %v466_v26 = vsub.f32 %v429_v43, %v447_v12 }
 0x103   : > { %v465_v29 = vsub.f32 %v428_v41, %v447_v12  ;;  %v464_v31 = vsub.f32 %v1053_v40, %v447_v12 }
 0x104   : > { %v463_v15 = vsub.f32 %v461_v13, %v462_v14 }
 0x106   : > { %v468_v16 = vadd.f32 1e-05, %v463_v15 }
 0x108   : > { %800 = vrsqrt.f32 %v468_v16  ;;  %vm475_vm3 = vweird.f32 %v468_v16 }
 0x10e   : > { %v801_v17 = vpop.eup %800 }
 0x10f   : > { %v470_v18 = vmul.f32 %v801_v17, %v468_v16  ;;  %vm476_vm2 = vweird.f32 %v801_v17 }
 0x110   : > { %vm477_vm4 = vmor %vm475_vm3, %vm476_vm2 }
 0x111   : > { %v471_v19 = vmul.f32 %v801_v17, %v470_v18 }
 0x113   : > { %v472_v20 = vmul.f32 0.5, %v471_v19 }
 0x115   : > { %v473_v21 = vsub.f32 1.5, %v472_v20 }
 0x117   : > { %v474_v22 = vmul.f32 %v801_v17, %v473_v21 }
 0x119   : > { %v478_v24 = vsel %vm477_vm4, %v801_v17, %v474_v22 }
 0x11a   : > { %v482_v25 = vmul.f32 %v478_v24, %v467_v23  ;;  %v481_v28 = vmul.f32 %v478_v24, %v466_v26  ;;  %v480_v30 = vmul.f32 %v478_v24, %v465_v29  ;;  %v479_v32 = vmul.f32 %v478_v24, %v464_v31 }
 0x11c   : > { %528 = vmatpush.msra.mxu1 %v482_v25 }
 0x11e   : > { %529 = vmatpush.msra.mxu1 %v481_v28 }
 0x120   : > { %530 = vmatpush.msra.mxu1 %v480_v30 }
 0x122   : > { %531 = vmatpush.msra.mxu1 %v479_v32 }
 0x123   : > { %731 = vmatmul.msk.f32.vlgmr.msra.gmra.mxu1 %vm503_vm5, %v303_v33 }
 0x12b   : > { %732 = vmatmul.msk.f32.gmra.mxu1 %vm503_vm5, %v304_v35 }
 0x131   : > { %v486_v38 = vpop.permute.xlu2 %485 }
 0x133   : > { %733 = vmatmul.msk.f32.gmra.mxu1 %vm503_vm5, %v305_v36  ;;  %v311_v36 = vld [vmem:[%s1128_s5] sm:$0x1] }
 0x13b   : > { %734 = vmatmul.msk.f32.gmra.mxu1 %vm503_vm5, %v306_v37  ;;  %v598_v37 = vstv %s312_s23 }
 0x13f   : > { %v491_v41 = vpop.permute.xlu2 %490 }
 0x1a0   : > { %v533_v39 = vpop.f32.mrf.mxu1 }
 0x1a1   : > { %v534_v43 = vadd.f32 %v533_v39, %v486_v38 }
 0x1a3   : > { %v545_v48 = vmul.f32 0.01, %v534_v43 }
 0x1a5   : > { %v549_v51 = vmax.f32 %v534_v43, %v545_v48 }
 0x1a7   : > { %v563_v57 = vmul.f32 %v549_v51, %v549_v51 }
 0x1a8   : > { %v536_v40 = vpop.f32.mrf.mxu1 }
 0x1a9   : > { %v537_v42 = vadd.f32 %v536_v40, %v491_v41 }
 0x1ab   : > { %v546_v46 = vmul.f32 0.01, %v537_v42 }
 0x1ad   : > { %v550_v50 = vmax.f32 %v537_v42, %v546_v46 }
 0x1af   : > { %v564_v55 = vmul.f32 %v550_v50, %v550_v50  ;;  %v553_v58 = vadd.f32 %v550_v50, %v549_v51 }
 0x1b0   : > { %v539_v45 = vpop.f32.mrf.mxu1 }
 0x1b1   : > { %v540_v47 = vadd.f32 %v539_v45, %v496_v44  ;;  %v567_v61 = vadd.f32 %v564_v55, %v563_v57 }
 0x1b3   : > { %v547_v49 = vmul.f32 0.01, %v540_v47 }
 0x1b5   : > { %v551_v52 = vmax.f32 %v540_v47, %v547_v49 }
 0x1b7   : > { %v565_v59 = vmul.f32 %v551_v52, %v551_v52  ;;  %v554_v62 = vadd.f32 %v553_v58, %v551_v52 }
 0x1b8   : > { %v542_v54 = vpop.f32.mrf.mxu1 }
 0x1b9   : > { %v543_v56 = vadd.f32 %v542_v54, %v501_v53  ;;  %v568_v0 = vadd.f32 %v567_v61, %v565_v59 }
 0x1bb   : > { %v548_v60 = vmul.f32 0.01, %v543_v56 }
 0x1bd   : > { %v552_v63 = vmax.f32 %v543_v56, %v548_v60 }
 0x1bf   : > { %v555_v1 = vadd.f32 %v554_v62, %v552_v63  ;;  %v566_v2 = vmul.f32 %v552_v63, %v552_v63 }
 0x1c1   : > { %v556_v3 = vrot.slane %v555_v1, 4  ;;  %v569_v4 = vadd.f32 %v568_v0, %v566_v2 }
 0x1c3   : > { %v557_v5 = vadd.f32 %v556_v3, %v555_v1  ;;  %v570_v6 = vrot.slane %v569_v4, 4 }
 0x1c5   : > { %v558_v7 = vrot.slane %v557_v5, 2  ;;  %v571_v9 = vadd.f32 %v570_v6, %v569_v4 }
 0x1c7   : > { %v559_v10 = vadd.f32 %v558_v7, %v557_v5  ;;  %v572_v11 = vrot.slane %v571_v9, 2 }
 0x1c9   : > { %v560_v12 = vrot.slane %v559_v10, 1  ;;  %v573_v13 = vadd.f32 %v572_v11, %v571_v9 }
 0x1cb   : > { %v561_v14 = vadd.f32 %v560_v12, %v559_v10  ;;  %v574_v15 = vrot.slane %v573_v13, 1 }
 0x1cd   : > { %v575_v16 = vadd.f32 %v574_v15, %v573_v13  ;;  %v562_v17 = vmul.f32 %v561_v14, %v1058_v8 }
 0x1cf   : > { %v576_v18 = vmul.f32 %v575_v16, %v1058_v8  ;;  %v577_v19 = vmul.f32 %v562_v17, %v562_v17  ;;  %v582_v28 = vsub.f32 %v552_v63, %v562_v17  ;;  %v581_v31 = vsub.f32 %v551_v52, %v562_v17 }
 0x1d0   : > { %v580_v8 = vsub.f32 %v550_v50, %v562_v17  ;;  %v579_v34 = vsub.f32 %v549_v51, %v562_v17 }
 0x1d1   : > { %v578_v20 = vsub.f32 %v576_v18, %v577_v19 }
 0x1d3   : > { %v583_v21 = vadd.f32 1e-05, %v578_v20 }
 0x1d5   : > { %802 = vrsqrt.f32 %v583_v21  ;;  %vm590_vm7 = vweird.f32 %v583_v21 }
 0x1db   : > { %v803_v22 = vpop.eup %802 }
 0x1dc   : > { %v585_v23 = vmul.f32 %v803_v22, %v583_v21  ;;  %vm591_vm6 = vweird.f32 %v803_v22 }
 0x1dd   : > { %vm592_vm8 = vmor %vm590_vm7, %vm591_vm6 }
 0x1de   : > { %v586_v24 = vmul.f32 %v803_v22, %v585_v23 }
 0x1e0   : > { %v587_v25 = vmul.f32 0.5, %v586_v24 }
 0x1e2   : > { %v588_v26 = vsub.f32 1.5, %v587_v25 }
 0x1e4   : > { %v589_v27 = vmul.f32 %v803_v22, %v588_v26 }
 0x1e6   : > { %v593_v29 = vsel %vm592_vm8, %v803_v22, %v589_v27 }
 0x1e7   : > { %v597_v30 = vmul.f32 %v593_v29, %v582_v28  ;;  %v596_v32 = vmul.f32 %v593_v29, %v581_v31  ;;  %v595_v33 = vmul.f32 %v593_v29, %v580_v8  ;;  %v594_v35 = vmul.f32 %v593_v29, %v579_v34 }
 0x1e9   : > { %614 = vmatpush.msra.mxu2 %v597_v30 }
 0x1eb   : > { %615 = vmatpush.msra.mxu2 %v596_v32 }
 0x1ed   : > { %616 = vmatpush.msra.mxu2 %v595_v33 }
 0x1ef   : > { %617 = vmatpush.msra.mxu2 %v594_v35 }
 0x1f0   : > { %735 = vmatmul.msk.f32.vlgmr.msra.gmra.mxu2 %vm503_vm5, %v311_v36 }
 0x273   : > { %v619_v38 = vpop.f32.mrf.mxu2 }
 0x274   : > { %v620_v39 = vadd.f32 %v619_v38, %v598_v37 }
 0x276   : > { %v623_v40 = vmin.f32 %v620_v39, 20.0  ;;  %vm622_vm10 = vcmp.gt.f32.partialorder %v620_v39, 20.0 }
 0x278   : > { %v624_v41 = vmul.f32 1.442695, %v623_v40 }
 0x27a   : > { %804 = vpow2.f32 %v624_v41 }
 0x280   : > { %v805_v42 = vpop.eup %804 }
 0x281   : > { %v626_v43 = vadd.f32 1.0, %v805_v42  ;;  %v629_v44 = vmul.f32 -0.5, %v805_v42  ;;  %v632_v46 = vand.u32 2147483647, %v805_v42 }
 0x283   : > { %806 = vlog2.f32 %v626_v43  ;;  %v630_v45 = vadd.f32 1.0, %v629_v44  ;;  %vm633_vm9 = vcmp.lt.f32.partialorder %v632_v46, 0.0004427343 }
 0x285   : > { %v631_v49 = vmul.f32 %v805_v42, %v630_v45 }
 0x289   : > { %v807_v47 = vpop.eup %806 }
 0x28a   : > { %v628_v48 = vmul.f32 0.6931472, %v807_v47 }
 0x28c   : > { %v634_v50 = vsel %vm633_vm9, %v631_v49, %v628_v48 }
 0x28d   : > { %v635_v51 = vsel %vm622_vm10, %v620_v39, %v634_v50 }
 0x28e   : > { %636 = vst [vmem:[%s272_s10] sm:$0x1] %v635_v51 }
 0x28f   : > { %835 = shalt.err (!%p832_p3)
}
 0x290   : > { %754 = dma.vmem_to_hbm [thread:$0]  (%p955_p5), %s649_s14, 16, %s651_s15, %s638_s16  }
 0x291 PF: > { %p760_p4 = scmp.ge.s32.totalorder %s870_s29, 2  ;;  %s662_s23 = sand.u32 1, %s858_s26  }
 0x292   : > { %s663_s24 = scalar_lea.sflag [#allocation4], %s662_s23 }
 0x293   : > { %p757_p7 = pnand %p760_p4, %p959_p6 }
 0x295   : > { %p758_p8 = pneg %p757_p7 }
 0x297   : > { %853 = dma.done.wait (%p758_p8), %s663_s24, 16  }
 0x298   : > { %855 = vsyncadd (%p758_p8), %s663_s24, 4294967280  ;;  %p18_p9 = scmp.ge.s32.totalorder %s942_s8, 4   ;;  %s1133_s26 = smov %s862_s27 }
 0x299   : > { %s1134_s27 = smov %s866_s28  ;;  %s1135_s28 = smov %s953_s11 }
 0x29a   : > { %s1136_s29 = smov %s942_s8  ;;  %20 = sbr.rel (!%p18_p9) target bundleno = 5 (0x5), region = 83 }
 0x29f   :  { %668 = vsyncpa [#allocation4], 1 }
 0x2a0   :  { %670 = vsyncpa [#allocation4 + $0x1], 1 }

</bundles_post_ra>
